<compile_context>
chip_gen: v7x
topology: tpu7x:2x2x1
jax: 0.10.0
libtpu: 0.0.40
codegen_flags: <defaults>
</compile_context>

<pallas_src>
import functools

import jax
import jax.numpy as jnp
from jax import lax
from jax.experimental import pallas as pl
from jax.experimental.pallas import tpu as pltpu

EPS = 1e-5           # nn.InstanceNorm2d default eps
NEG_SLOPE = 0.01     # nn.LeakyReLU default negative_slope


def _conv_block_kernel(x_ref, r_ref, g_ref, o_ref, xp_ref, *, NB, H, W, C_in, C_out):
    # x_ref : (NB, H, W*C_in)            NB input images, channels fused into lanes
    # r_ref : (3, W*C_in, W*C_out)       banded conv RHS (kw taps + W zero-pad folded in)
    # g_ref : (C_out, W*C_out)           0/1 channel reduce/broadcast matrix
    # o_ref : (NB, H, W*C_out)           lane-dense output block
    # xp_ref: (NB*(H+2), W*C_in)         VMEM scratch: zero-separated padded slab
    P = H + 2
    L = NB * P

    # --- Build the zero-separated slab: one zero fill gives every image's H halos. ---
    xp_ref[...] = jnp.zeros_like(xp_ref)
    for b in range(NB):                       # NB is a small static Python int
        xp_ref[b * P + 1:b * P + 1 + H, :] = x_ref[b]

    # --- Conv: 3 MXU dots (one per kh row tap) over the whole NB-image slab. ---
    acc = jnp.dot(xp_ref[0:L - 2, :], r_ref[0], preferred_element_type=jnp.float32)
    acc = acc + jnp.dot(xp_ref[1:L - 1, :], r_ref[1], preferred_element_type=jnp.float32)
    acc = acc + jnp.dot(xp_ref[2:L, :], r_ref[2], preferred_element_type=jnp.float32)
    # acc: (L-2, W*C_out) float32; image b's rows are acc[b*P : b*P + H] (the two rows
    # straddling each image boundary are never read).

    # --- InstanceNorm2d(affine=False) + LeakyReLU, fused, per image. ---
    # (conv bias omitted: the per-(n,c) mean subtraction cancels it exactly.)
    inv_hw = 1.0 / float(H * W)
    for b in range(NB):
        a = acc[b * P:b * P + H, :]                                       # (H, W*C_out)
        col_stats = jnp.concatenate(
            [jnp.sum(a, axis=0, keepdims=True),
             jnp.sum(a * a, axis=0, keepdims=True)], axis=0)              # (2, W*C_out)
        # Per-channel reduction across W on the MXU (contract lane axes of both operands).
        ch_stats = lax.dot_general(col_stats, g_ref[...],
                                   (((1,), (1,)), ((), ())),
                                   preferred_element_type=jnp.float32)    # (2, C_out)
        mean = ch_stats[0:1, :] * inv_hw                                  # (1, C_out)
        var = ch_stats[1:2, :] * inv_hw - mean * mean                     # E[x^2] - mean^2
        inv_std = lax.rsqrt(jnp.maximum(var, 0.0) + EPS)                  # (1, C_out)
        # Broadcast per-channel (scale, shift) across the W-major lane layout via G.
        coeff = jnp.concatenate([inv_std, -mean * inv_std], axis=0)       # (2, C_out)
        coeff_row = jnp.dot(coeff, g_ref[...],
                            preferred_element_type=jnp.float32)           # (2, W*C_out)
        y = a * coeff_row[0:1, :] + coeff_row[1:2, :]
        y = jnp.where(y > 0, y, NEG_SLOPE * y)
        o_ref[b] = y.astype(o_ref.dtype)


def _images_per_step(N, H, W, C_in, C_out, itemsize=4, vmem_budget=16 * 1024 * 1024):
    """Pick how many images to pack per grid step (divisor of N, VMEM-bounded)."""
    per_img = itemsize * (
        2 * H * W * C_in            # double-buffered input block
        + 2 * H * W * C_out         # double-buffered output block
        + (H + 2) * W * C_in        # padded slab scratch
        + (H + 2) * W * C_out)      # live f32 conv accumulator
    cap = max(1, min(N, 8, vmem_budget // max(per_img, 1)))
    nb = 1
    for cand in range(1, int(cap) + 1):
        if N % cand == 0:
            nb = cand
    return nb


def conv_block_forward(x_nchw, weight_oihw, bias=None, *, compute_dtype=jnp.float32):
    """x_nchw: (N, C_in, H, W); weight_oihw: (C_out, C_in, 3, 3); bias: (C_out,) (unused,
    see note below). Returns (N, C_out, H, W)."""
    N, C_in, H, W = x_nchw.shape
    C_out = weight_oihw.shape[0]
    NB = _images_per_step(N, H, W, C_in, C_out)

    # NCHW -> NHWC -> (N, H, W*C_in): channels fused into the lane axis. No HBM-side pad.
    x2d = (jnp.transpose(x_nchw, (0, 2, 3, 1))
           .reshape(N, H, W * C_in)
           .astype(compute_dtype))

    # Banded RHS: R[kh, w_in*C_in+ci, w_out*C_out+co] = w_hwio[kh, w_in-w_out+1, ci, co]
    # for w_in-w_out+1 in {0,1,2}, else 0 (which also implements the W zero padding).
    w_hwio = jnp.transpose(weight_oihw, (2, 3, 1, 0)).astype(jnp.float32)  # (3,3,Cin,Cout)
    w_idx = jnp.arange(W)
    sel = jnp.stack(
        [(w_idx[:, None] == (w_idx[None, :] + (kw - 1))).astype(jnp.float32)
         for kw in range(3)], axis=0)                                      # (3, W_in, W_out)
    r_mat = jnp.einsum('abcd,bwv->awcvd', w_hwio, sel)                     # (3,W,Cin,W,Cout)
    r_mat = r_mat.reshape(3, W * C_in, W * C_out).astype(compute_dtype)

    # 0/1 matrix used in-kernel to reduce / broadcast per-channel stats across W.
    g_mat = jnp.tile(jnp.eye(C_out, dtype=jnp.float32), (1, W))            # (Cout, W*Cout)

    # NOTE: `bias` is intentionally unused: InstanceNorm2d(affine=False) subtracts the
    # per-(n, c) mean, which exactly cancels a per-channel conv bias.
    del bias

    kernel = functools.partial(_conv_block_kernel,
                               NB=NB, H=H, W=W, C_in=C_in, C_out=C_out)

    out2d = pl.pallas_call(
        kernel,
        out_shape=jax.ShapeDtypeStruct((N, H, W * C_out), jnp.float32),
        grid_spec=pltpu.PrefetchScalarGridSpec(
            num_scalar_prefetch=0,
            grid=(N // NB,),
            in_specs=[
                pl.BlockSpec((NB, H, W * C_in), lambda n: (n, 0, 0)),
                pl.BlockSpec((3, W * C_in, W * C_out), lambda n: (0, 0, 0)),
                pl.BlockSpec((C_out, W * C_out), lambda n: (0, 0)),
            ],
            out_specs=pl.BlockSpec((NB, H, W * C_out), lambda n: (n, 0, 0)),
            scratch_shapes=[pltpu.VMEM((NB * (H + 2), W * C_in), compute_dtype)],
        ),
        compiler_params=pltpu.CompilerParams(
            dimension_semantics=("parallel",),
            vmem_limit_bytes=32 * 1024 * 1024,
        ),
    )(x2d, r_mat, g_mat)

    # (N, H, W*C_out) -> (N, H, W, C_out) -> NCHW
    return jnp.transpose(out2d.reshape(N, H, W, C_out), (0, 3, 1, 2))


def _reference(x_nchw, weight_oihw, bias):
    # Pure-JAX reference (same semantics as the PyTorch module, including the bias).
    y = lax.conv_general_dilated(
        x_nchw, weight_oihw, window_strides=(1, 1), padding=((1, 1), (1, 1)),
        dimension_numbers=("NCHW", "OIHW", "NCHW"))
    y = y + bias.reshape(1, -1, 1, 1)
    mean = jnp.mean(y, axis=(2, 3), keepdims=True)
    var = jnp.mean((y - mean) ** 2, axis=(2, 3), keepdims=True)
    y = (y - mean) * lax.rsqrt(var + EPS)
    return jnp.where(y > 0, y, NEG_SLOPE * y)


if __name__ == "__main__":
    key = jax.random.PRNGKey(0)
    k_x, k_w, k_b = jax.random.split(key, 3)

    N, C_in, C_out, H, W = 2, 4, 8, 16, 16          # W*C_out = 128 -> lane-dense output
    x = jax.random.normal(k_x, (N, C_in, H, W), dtype=jnp.float32)
    fan_in = C_in * 9
    bound = 1.0 / (fan_in ** 0.5)
    weight = jax.random.uniform(k_w, (C_out, C_in, 3, 3), jnp.float32, -bound, bound)
    bias = jax.random.uniform(k_b, (C_out,), jnp.float32, -bound, bound)

    out = conv_block_forward(x, weight, bias)
    out = jax.block_until_ready(out)

    ref = _reference(x, weight, bias)
    assert out.shape == (N, C_out, H, W)
    assert jnp.allclose(out, ref, atol=1e-4, rtol=1e-4), float(jnp.max(jnp.abs(out - ref)))

    print("KERNEL_OK")
</pallas_src>

<mosaic_0001>
module attributes {stable_mosaic.version = 11 : i64} {
  func.func @_conv_block_kernel(%arg0: i32, %arg1: memref<2x16x64xf32, #tpu.memory_space<vmem>>, %arg2: memref<3x64x128xf32, #tpu.memory_space<vmem>>, %arg3: memref<8x128xf32, #tpu.memory_space<vmem>>, %arg4: memref<2x16x128xf32, #tpu.memory_space<vmem>>, %arg5: memref<36x64xf32, #tpu.memory_space<vmem>>) attributes {dimension_semantics = [#tpu.dimension_semantics<parallel>], iteration_bounds = array<i64: 1>, scalar_prefetch = 0 : i64, scratch_operands = 1 : i64, tpu.core_type = #tpu.core_type<tc>, window_params = [{transform_indices = @transform_0, window_bounds = array<i64: 2, 16, 64>}, {pipeline_mode = #tpu.pipeline_mode<synchronous>, transform_indices = @transform_1, window_bounds = array<i64: 3, 64, 128>}, {pipeline_mode = #tpu.pipeline_mode<synchronous>, transform_indices = @transform_2, window_bounds = array<i64: 8, 128>}, {transform_indices = @transform_3, window_bounds = array<i64: 2, 16, 128>}]} {
    %cst = arith.constant 0.000000e+00 : f32
    %0 = vector.broadcast %cst : f32 to vector<36x64xf32>
    %c0 = arith.constant 0 : index
    %c0_0 = arith.constant 0 : index
    %1 = vector.load %arg5[%c0, %c0_0] : memref<36x64xf32, #tpu.memory_space<vmem>>, vector<36x64xf32>
    tpu.vector_store %arg5[%c0, %c0_0], %0 {strides = array<i32>} : memref<36x64xf32, #tpu.memory_space<vmem>>, vector<36x64xf32>,
    %c0_1 = arith.constant 0 : index
    %c0_2 = arith.constant 0 : index
    %c0_3 = arith.constant 0 : index
    %2 = vector.load %arg1[%c0_1, %c0_2, %c0_3] : memref<2x16x64xf32, #tpu.memory_space<vmem>>, vector<1x16x64xf32>
    %3 = vector.shape_cast %2 : vector<1x16x64xf32> to vector<16x64xf32>
    %c1 = arith.constant 1 : index
    %c0_4 = arith.constant 0 : index
    %4 = vector.load %arg5[%c1, %c0_4] : memref<36x64xf32, #tpu.memory_space<vmem>>, vector<16x64xf32>
    tpu.vector_store %arg5[%c1, %c0_4], %3 {strides = array<i32>} : memref<36x64xf32, #tpu.memory_space<vmem>>, vector<16x64xf32>,
    %c1_5 = arith.constant 1 : index
    %c0_6 = arith.constant 0 : index
    %c0_7 = arith.constant 0 : index
    %5 = vector.load %arg1[%c1_5, %c0_6, %c0_7] : memref<2x16x64xf32, #tpu.memory_space<vmem>>, vector<1x16x64xf32>
    %6 = vector.shape_cast %5 : vector<1x16x64xf32> to vector<16x64xf32>
    %c19 = arith.constant 19 : index
    %c0_8 = arith.constant 0 : index
    %7 = vector.load %arg5[%c19, %c0_8] : memref<36x64xf32, #tpu.memory_space<vmem>>, vector<16x64xf32>
    tpu.vector_store %arg5[%c19, %c0_8], %6 {strides = array<i32>} : memref<36x64xf32, #tpu.memory_space<vmem>>, vector<16x64xf32>,
    %c0_9 = arith.constant 0 : index
    %c0_10 = arith.constant 0 : index
    %8 = vector.load %arg5[%c0_9, %c0_10] : memref<36x64xf32, #tpu.memory_space<vmem>>, vector<34x64xf32>
    %c0_11 = arith.constant 0 : index
    %c0_12 = arith.constant 0 : index
    %c0_13 = arith.constant 0 : index
    %9 = vector.load %arg2[%c0_11, %c0_12, %c0_13] : memref<3x64x128xf32, #tpu.memory_space<vmem>>, vector<1x64x128xf32>
    %10 = vector.shape_cast %9 : vector<1x64x128xf32> to vector<64x128xf32>
    %cst_14 = arith.constant dense<0.000000e+00> : vector<34x128xf32>
    %11 = tpu.matmul %8, %10, %cst_14 {dimension_numbers = #tpu.dot_dimension_numbers<[1], [0], [0], [1], [0, 0, 1, 1], [], []>} : vector<34x64xf32>, vector<64x128xf32>, vector<34x128xf32> -> vector<34x128xf32>
    %c1_15 = arith.constant 1 : index
    %c0_16 = arith.constant 0 : index
    %12 = vector.load %arg5[%c1_15, %c0_16] : memref<36x64xf32, #tpu.memory_space<vmem>>, vector<34x64xf32>
    %c1_17 = arith.constant 1 : index
    %c0_18 = arith.constant 0 : index
    %c0_19 = arith.constant 0 : index
    %13 = vector.load %arg2[%c1_17, %c0_18, %c0_19] : memref<3x64x128xf32, #tpu.memory_space<vmem>>, vector<1x64x128xf32>
    %14 = vector.shape_cast %13 : vector<1x64x128xf32> to vector<64x128xf32>
    %cst_20 = arith.constant dense<0.000000e+00> : vector<34x128xf32>
    %15 = tpu.matmul %12, %14, %cst_20 {dimension_numbers = #tpu.dot_dimension_numbers<[1], [0], [0], [1], [0, 0, 1, 1], [], []>} : vector<34x64xf32>, vector<64x128xf32>, vector<34x128xf32> -> vector<34x128xf32>
    %16 = arith.addf %11, %15 : vector<34x128xf32>
    %c2 = arith.constant 2 : index
    %c0_21 = arith.constant 0 : index
    %17 = vector.load %arg5[%c2, %c0_21] : memref<36x64xf32, #tpu.memory_space<vmem>>, vector<34x64xf32>
    %c2_22 = arith.constant 2 : index
    %c0_23 = arith.constant 0 : index
    %c0_24 = arith.constant 0 : index
    %18 = vector.load %arg2[%c2_22, %c0_23, %c0_24] : memref<3x64x128xf32, #tpu.memory_space<vmem>>, vector<1x64x128xf32>
    %19 = vector.shape_cast %18 : vector<1x64x128xf32> to vector<64x128xf32>
    %cst_25 = arith.constant dense<0.000000e+00> : vector<34x128xf32>
    %20 = tpu.matmul %17, %19, %cst_25 {dimension_numbers = #tpu.dot_dimension_numbers<[1], [0], [0], [1], [0, 0, 1, 1], [], []>} : vector<34x64xf32>, vector<64x128xf32>, vector<34x128xf32> -> vector<34x128xf32>
    %21 = arith.addf %16, %20 : vector<34x128xf32>
    %22 = vector.extract_strided_slice %21 {offsets = [0, 0], sizes = [16, 128], strides = [1, 1]} : vector<34x128xf32> to vector<16x128xf32>
    %cst_26 = arith.constant dense<0.000000e+00> : vector<128xf32>
    %23 = vector.multi_reduction <add>, %22, %cst_26 [0] : vector<16x128xf32> to vector<128xf32>
    %24 = vector.shape_cast %23 : vector<128xf32> to vector<1x128xf32>
    %25 = arith.mulf %22, %22 : vector<16x128xf32>
    %cst_27 = arith.constant dense<0.000000e+00> : vector<128xf32>
    %26 = vector.multi_reduction <add>, %25, %cst_27 [0] : vector<16x128xf32> to vector<128xf32>
    %27 = vector.shape_cast %26 : vector<128xf32> to vector<1x128xf32>
    %28 = tpu.concatenate %24, %27 in 0 : vector<1x128xf32>, vector<1x128xf32> -> vector<2x128xf32>
    %c0_28 = arith.constant 0 : index
    %c0_29 = arith.constant 0 : index
    %29 = vector.load %arg3[%c0_28, %c0_29] : memref<8x128xf32, #tpu.memory_space<vmem>>, vector<8x128xf32>
    %cst_30 = arith.constant dense<0.000000e+00> : vector<2x8xf32>
    %30 = tpu.matmul %28, %29, %cst_30 {dimension_numbers = #tpu.dot_dimension_numbers<[1], [1], [0], [0], [0, 0, 1, 0], [], []>} : vector<2x128xf32>, vector<8x128xf32>, vector<2x8xf32> -> vector<2x8xf32>
    %31 = vector.extract_strided_slice %30 {offsets = [0, 0], sizes = [1, 8], strides = [1, 1]} : vector<2x8xf32> to vector<1x8xf32>
    %cst_31 = arith.constant 3.906250e-03 : f32
    %32 = vector.broadcast %cst_31 : f32 to vector<1x8xf32>
    %33 = arith.mulf %31, %32 : vector<1x8xf32>
    %34 = vector.extract_strided_slice %30 {offsets = [1, 0], sizes = [1, 8], strides = [1, 1]} : vector<2x8xf32> to vector<1x8xf32>
    %cst_32 = arith.constant 3.906250e-03 : f32
    %35 = vector.broadcast %cst_32 : f32 to vector<1x8xf32>
    %36 = arith.mulf %34, %35 : vector<1x8xf32>
    %37 = arith.mulf %33, %33 : vector<1x8xf32>
    %38 = arith.subf %36, %37 : vector<1x8xf32>
    %cst_33 = arith.constant 0.000000e+00 : f32
    %39 = vector.broadcast %cst_33 : f32 to vector<1x8xf32>
    %40 = arith.maximumf %38, %39 : vector<1x8xf32>
    %cst_34 = arith.constant 9.99999974E-6 : f32
    %41 = vector.broadcast %cst_34 : f32 to vector<1x8xf32>
    %42 = arith.addf %40, %41 : vector<1x8xf32>
    %43 = math.rsqrt %42 : vector<1x8xf32>
    %cst_35 = arith.constant 0.000000e+00 : f32
    %44 = vector.broadcast %cst_35 : f32 to vector<1x8xf32>
    %45 = arith.subf %44, %33 : vector<1x8xf32>
    %46 = arith.mulf %45, %43 : vector<1x8xf32>
    %47 = tpu.concatenate %43, %46 in 0 : vector<1x8xf32>, vector<1x8xf32> -> vector<2x8xf32>
    %c0_36 = arith.constant 0 : index
    %c0_37 = arith.constant 0 : index
    %48 = vector.load %arg3[%c0_36, %c0_37] : memref<8x128xf32, #tpu.memory_space<vmem>>, vector<8x128xf32>
    %cst_38 = arith.constant dense<0.000000e+00> : vector<2x128xf32>
    %49 = tpu.matmul %47, %48, %cst_38 {dimension_numbers = #tpu.dot_dimension_numbers<[1], [0], [0], [1], [0, 0, 1, 1], [], []>} : vector<2x8xf32>, vector<8x128xf32>, vector<2x128xf32> -> vector<2x128xf32>
    %50 = vector.extract_strided_slice %49 {offsets = [0, 0], sizes = [1, 128], strides = [1, 1]} : vector<2x128xf32> to vector<1x128xf32>
    %51 = vector.broadcast %50 : vector<1x128xf32> to vector<16x128xf32>
    %52 = arith.mulf %22, %51 : vector<16x128xf32>
    %53 = vector.extract_strided_slice %49 {offsets = [1, 0], sizes = [1, 128], strides = [1, 1]} : vector<2x128xf32> to vector<1x128xf32>
    %54 = vector.broadcast %53 : vector<1x128xf32> to vector<16x128xf32>
    %55 = arith.addf %52, %54 : vector<16x128xf32>
    %cst_39 = arith.constant 0.000000e+00 : f32
    %56 = vector.broadcast %cst_39 : f32 to vector<16x128xf32>
    %57 = arith.cmpf ogt, %55, %56 : vector<16x128xf32>
    %cst_40 = arith.constant 0.00999999977 : f32
    %58 = vector.broadcast %cst_40 : f32 to vector<16x128xf32>
    %59 = arith.mulf %58, %55 : vector<16x128xf32>
    %60 = arith.select %57, %55, %59 : vector<16x128xi1>, vector<16x128xf32>
    %c0_41 = arith.constant 0 : index
    %c0_42 = arith.constant 0 : index
    %c0_43 = arith.constant 0 : index
    %61 = vector.load %arg4[%c0_41, %c0_42, %c0_43] : memref<2x16x128xf32, #tpu.memory_space<vmem>>, vector<1x16x128xf32>
    %62 = vector.shape_cast %61 : vector<1x16x128xf32> to vector<16x128xf32>
    %63 = vector.shape_cast %60 : vector<16x128xf32> to vector<1x16x128xf32>
    tpu.vector_store %arg4[%c0_41, %c0_42, %c0_43], %63 {strides = array<i32>} : memref<2x16x128xf32, #tpu.memory_space<vmem>>, vector<1x16x128xf32>,
    %64 = vector.extract_strided_slice %21 {offsets = [18, 0], sizes = [16, 128], strides = [1, 1]} : vector<34x128xf32> to vector<16x128xf32>
    %cst_44 = arith.constant dense<0.000000e+00> : vector<128xf32>
    %65 = vector.multi_reduction <add>, %64, %cst_44 [0] : vector<16x128xf32> to vector<128xf32>
    %66 = vector.shape_cast %65 : vector<128xf32> to vector<1x128xf32>
    %67 = arith.mulf %64, %64 : vector<16x128xf32>
    %cst_45 = arith.constant dense<0.000000e+00> : vector<128xf32>
    %68 = vector.multi_reduction <add>, %67, %cst_45 [0] : vector<16x128xf32> to vector<128xf32>
    %69 = vector.shape_cast %68 : vector<128xf32> to vector<1x128xf32>
    %70 = tpu.concatenate %66, %69 in 0 : vector<1x128xf32>, vector<1x128xf32> -> vector<2x128xf32>
    %c0_46 = arith.constant 0 : index
    %c0_47 = arith.constant 0 : index
    %71 = vector.load %arg3[%c0_46, %c0_47] : memref<8x128xf32, #tpu.memory_space<vmem>>, vector<8x128xf32>
    %cst_48 = arith.constant dense<0.000000e+00> : vector<2x8xf32>
    %72 = tpu.matmul %70, %71, %cst_48 {dimension_numbers = #tpu.dot_dimension_numbers<[1], [1], [0], [0], [0, 0, 1, 0], [], []>} : vector<2x128xf32>, vector<8x128xf32>, vector<2x8xf32> -> vector<2x8xf32>
    %73 = vector.extract_strided_slice %72 {offsets = [0, 0], sizes = [1, 8], strides = [1, 1]} : vector<2x8xf32> to vector<1x8xf32>
    %cst_49 = arith.constant 3.906250e-03 : f32
    %74 = vector.broadcast %cst_49 : f32 to vector<1x8xf32>
    %75 = arith.mulf %73, %74 : vector<1x8xf32>
    %76 = vector.extract_strided_slice %72 {offsets = [1, 0], sizes = [1, 8], strides = [1, 1]} : vector<2x8xf32> to vector<1x8xf32>
    %cst_50 = arith.constant 3.906250e-03 : f32
    %77 = vector.broadcast %cst_50 : f32 to vector<1x8xf32>
    %78 = arith.mulf %76, %77 : vector<1x8xf32>
    %79 = arith.mulf %75, %75 : vector<1x8xf32>
    %80 = arith.subf %78, %79 : vector<1x8xf32>
    %cst_51 = arith.constant 0.000000e+00 : f32
    %81 = vector.broadcast %cst_51 : f32 to vector<1x8xf32>
    %82 = arith.maximumf %80, %81 : vector<1x8xf32>
    %cst_52 = arith.constant 9.99999974E-6 : f32
    %83 = vector.broadcast %cst_52 : f32 to vector<1x8xf32>
    %84 = arith.addf %82, %83 : vector<1x8xf32>
    %85 = math.rsqrt %84 : vector<1x8xf32>
    %cst_53 = arith.constant 0.000000e+00 : f32
    %86 = vector.broadcast %cst_53 : f32 to vector<1x8xf32>
    %87 = arith.subf %86, %75 : vector<1x8xf32>
    %88 = arith.mulf %87, %85 : vector<1x8xf32>
    %89 = tpu.concatenate %85, %88 in 0 : vector<1x8xf32>, vector<1x8xf32> -> vector<2x8xf32>
    %c0_54 = arith.constant 0 : index
    %c0_55 = arith.constant 0 : index
    %90 = vector.load %arg3[%c0_54, %c0_55] : memref<8x128xf32, #tpu.memory_space<vmem>>, vector<8x128xf32>
    %cst_56 = arith.constant dense<0.000000e+00> : vector<2x128xf32>
    %91 = tpu.matmul %89, %90, %cst_56 {dimension_numbers = #tpu.dot_dimension_numbers<[1], [0], [0], [1], [0, 0, 1, 1], [], []>} : vector<2x8xf32>, vector<8x128xf32>, vector<2x128xf32> -> vector<2x128xf32>
    %92 = vector.extract_strided_slice %91 {offsets = [0, 0], sizes = [1, 128], strides = [1, 1]} : vector<2x128xf32> to vector<1x128xf32>
    %93 = vector.broadcast %92 : vector<1x128xf32> to vector<16x128xf32>
    %94 = arith.mulf %64, %93 : vector<16x128xf32>
    %95 = vector.extract_strided_slice %91 {offsets = [1, 0], sizes = [1, 128], strides = [1, 1]} : vector<2x128xf32> to vector<1x128xf32>
    %96 = vector.broadcast %95 : vector<1x128xf32> to vector<16x128xf32>
    %97 = arith.addf %94, %96 : vector<16x128xf32>
    %cst_57 = arith.constant 0.000000e+00 : f32
    %98 = vector.broadcast %cst_57 : f32 to vector<16x128xf32>
    %99 = arith.cmpf ogt, %97, %98 : vector<16x128xf32>
    %cst_58 = arith.constant 0.00999999977 : f32
    %100 = vector.broadcast %cst_58 : f32 to vector<16x128xf32>
    %101 = arith.mulf %100, %97 : vector<16x128xf32>
    %102 = arith.select %99, %97, %101 : vector<16x128xi1>, vector<16x128xf32>
    %c1_59 = arith.constant 1 : index
    %c0_60 = arith.constant 0 : index
    %c0_61 = arith.constant 0 : index
    %103 = vector.load %arg4[%c1_59, %c0_60, %c0_61] : memref<2x16x128xf32, #tpu.memory_space<vmem>>, vector<1x16x128xf32>
    %104 = vector.shape_cast %103 : vector<1x16x128xf32> to vector<16x128xf32>
    %105 = vector.shape_cast %102 : vector<16x128xf32> to vector<1x16x128xf32>
    tpu.vector_store %arg4[%c1_59, %c0_60, %c0_61], %105 {strides = array<i32>} : memref<2x16x128xf32, #tpu.memory_space<vmem>>, vector<1x16x128xf32>,
    return
  }
  func.func @transform_0(%arg0: i32) -> (i32, i32, i32) {
    %c0_i32 = arith.constant 0 : i32
    %c0_i32_0 = arith.constant 0 : i32
    %c0_i32_1 = arith.constant 0 : i32
    return %arg0, %c0_i32, %c0_i32_0 : i32, i32, i32
  }
  func.func @transform_1(%arg0: i32) -> (i32, i32, i32) {
    %c0_i32 = arith.constant 0 : i32
    %c0_i32_0 = arith.constant 0 : i32
    %c0_i32_1 = arith.constant 0 : i32
    %c0_i32_2 = arith.constant 0 : i32
    return %c0_i32, %c0_i32_0, %c0_i32_1 : i32, i32, i32
  }
  func.func @transform_2(%arg0: i32) -> (i32, i32) {
    %c0_i32 = arith.constant 0 : i32
    %c0_i32_0 = arith.constant 0 : i32
    %c0_i32_1 = arith.constant 0 : i32
    return %c0_i32, %c0_i32_0 : i32, i32
  }
  func.func @transform_3(%arg0: i32) -> (i32, i32, i32) {
    %c0_i32 = arith.constant 0 : i32
    %c0_i32_0 = arith.constant 0 : i32
    %c0_i32_1 = arith.constant 0 : i32
    return %arg0, %c0_i32, %c0_i32_0 : i32, i32, i32
  }
}

</mosaic_0001>

<bundles_post_ra>
// kernel: tpu_custom_call.1
= control target key start
LH: loop header
LB: loop body
LE: loop exit
PB: predicated region body
PF: predicated region fallthrough
CT: control target
= control target key end

     0   :  { %8 = vsyncpa [#allocation4], 0  ;;  %s1430_s0 = inlined_call_operand.hbm [shape: f32[2,16,64], index: 0, kind: input, shape index: {}]   ;;  %s1431_s1 = inlined_call_operand.hbm [shape: f32[3,64,128], index: 1, kind: input, shape index: {}]   ;;  %s1432_s2 = inlined_call_operand.hbm [shape: f32[8,128], index: 2, kind: input, shape index: {}]   ;;  %s1433_s3 = inlined_call_operand.hbm [shape: f32[2,16,128], index: 3, kind: output, shape index: {}]  }
   0x1   :  { %9 = vsyncpa [#allocation7], 0 }
   0x2   :  { %10 = vsyncpa [#allocation5], 0  ;;  %s1213_s12 = smov [#allocation6]   ;;  %s1214_s14 = smov [#allocation3]  }
   0x3   :  { %s28_s13 = sshll.u32 %s1213_s12, 4  ;;  %s16_s15 = sshll.u32 %s1214_s14, 4  ;;  %s29_s13 = int_to_ptr.vmem [resolvable:$true] %s28_s13  ;;  %s1242_s15 = int_to_ptr.vmem [resolvable:$true] %s16_s15 }
   0x4   :  { %s1119_s18 = scalar_lea.hbm %s1431_s1, 3072 }
   0x5   :  { %p1120_p0 = scmp.ne.s32.totalorder %s1431_s1, %s1119_s18  ;;  %p1123_p1 = scmp.lt.u32.totalorder %s1119_s18, %s1431_s1 }
   0x7   :  { %p1125_p2 = pnand %p1123_p1, %p1120_p0 }
   0x9   :  { %1128 = shalt.err (!%p1125_p2)
}
   0xa   :  { %s1129_s23 = scalar_lea.vmem %s29_s13, 3072  ;;  %p1134_p4 = scmp.lt.s32.totalorder %s29_s13, %s29_s13 }
   0xb   :  { %p1130_p3 = scmp.ne.s32.totalorder %s29_s13, %s1129_s23  ;;  %p1135_p5 = scmp.lt.s32.totalorder %s1129_s23, %s1129_s23 }
   0xd   :  { %p1136_p6 = por %p1135_p5, %p1134_p4 }
   0xf   :  { %p1137_p7 = pnand %p1136_p6, %p1130_p3 }
  0x11   :  { %1140 = shalt.err (!%p1137_p7)
}
  0x12   :  { %s1215_s24 = smov 128   ;;  %s1216_s25 = smov 8  }
  0x13   :  { %34 = dma.hbm_to_vmem [thread:$0]  %s1431_s1, 3072, %s29_s13, [#allocation7], %s1215_s24, %s1215_s24, %s1216_s25  }
  0x14   :  { %s1141_s30 = scalar_lea.hbm %s1430_s0, 512 }
  0x15   :  { %p1142_p8 = scmp.ne.s32.totalorder %s1430_s0, %s1141_s30  ;;  %p1145_p9 = scmp.lt.u32.totalorder %s1141_s30, %s1430_s0 }
  0x17   :  { %p1147_p10 = pnand %p1145_p9, %p1142_p8 }
  0x19   :  { %1150 = shalt.err (!%p1147_p10)
}
  0x1a   :  { %s1151_s8 = scalar_lea.vmem %s1242_s15, 512  ;;  %p1156_p12 = scmp.lt.s32.totalorder %s1242_s15, %s1242_s15 }
  0x1b   :  { %p1152_p11 = scmp.ne.s32.totalorder %s1242_s15, %s1151_s8  ;;  %p1157_p13 = scmp.lt.s32.totalorder %s1151_s8, %s1151_s8 }
  0x1d   :  { %p1158_p0 = por %p1157_p13, %p1156_p12 }
  0x1f   :  { %p1159_p1 = pnand %p1158_p0, %p1152_p11 }
  0x21   :  { %1162 = shalt.err (!%p1159_p1)
}
  0x22   :  { %22 = dma.hbm_to_vmem [thread:$0]  %s1430_s0, 512, %s1242_s15, [#allocation4], %s1215_s24, %s1215_s24, %s1216_s25  }
  0x23   :  { %s1217_s10 = smov [#allocation8]   ;;  %s1163_s14 = scalar_lea.hbm %s1432_s2, 128 }
  0x24   :  { %s41_s11 = sshll.u32 %s1217_s10, 4  ;;  %p1164_p2 = scmp.ne.s32.totalorder %s1432_s2, %s1163_s14  ;;  %s42_s11 = int_to_ptr.vmem [resolvable:$true] %s41_s11 }
  0x25   :  { %p1167_p3 = scmp.lt.u32.totalorder %s1163_s14, %s1432_s2 }
  0x27   :  { %p1169_p4 = pnand %p1167_p3, %p1164_p2 }
  0x29   :  { %1172 = shalt.err (!%p1169_p4)
}
  0x2a   :  { %s1173_s20 = scalar_lea.vmem %s42_s11, 128  ;;  %p1178_p6 = scmp.lt.s32.totalorder %s42_s11, %s42_s11 }
  0x2b   :  { %p1174_p5 = scmp.ne.s32.totalorder %s42_s11, %s1173_s20  ;;  %p1179_p7 = scmp.lt.s32.totalorder %s1173_s20, %s1173_s20 }
  0x2d   :  { %p1180_p8 = por %p1179_p7, %p1178_p6 }
  0x2f   :  { %p1181_p9 = pnand %p1180_p8, %p1174_p5 }
  0x31   :  { %1184 = shalt.err (!%p1181_p9)
}
  0x32   :  { %44 = dma.hbm_to_vmem [thread:$0]  %s1432_s2, 128, %s42_s11, [#allocation7]  }
  0x33   :  { %1207 = dma.done.wait [#allocation4], 512  }
  0x34   :  { %1208 = vsyncadd [#allocation4], 4294966784 }
  0x35   :  { %1209 = dma.done.wait [#allocation7], 3200  }
  0x36   :  { %1210 = vsyncadd [#allocation7], 4294964096  ;;  %vm54_vm0 = vcmask 523264   ;;  %v1218_v0 = vmov 0.0|0.0   ;;  %vm1219_vm1 = vmmov 0   ;;  %v1220_v1 = vmov 0.0  }
  0x37   :  { %1067 = vmatprep.subr.bf16.mxu0 %v1218_v0  ;;  %989 = vmatprep.mubr.msk.f32.mxu0 %vm1219_vm1, %v1220_v1  ;;  %55 = vst.msk [vmem:[#allocation2] sm:$0xff] %vm54_vm0, %v1220_v1  ;;  %56 = vst.msk [vmem:[#allocation2 + $0x8] sm:$0xff] %vm54_vm0, %v1220_v1  ;;  %vm59_vm2 = vcmask 519168   ;;  %v75_v2 = vld [vmem:[#allocation6] sm:$0xff]  ;;  %v76_v3 = vld [vmem:[#allocation6 + $0x8] sm:$0xff]  ;;  %vm447_vm3 = vcmask 1040384  }
  0x38   :  { %57 = vst.msk [vmem:[#allocation2 + $0x10] sm:$0xff] %vm54_vm0, %v1220_v1  ;;  %58 = vst.msk [vmem:[#allocation2 + $0x18] sm:$0xff] %vm54_vm0, %v1220_v1  ;;  %1055 = vmatprep.subr.bf16.mxu1 %v1218_v0  ;;  %958 = vmatprep.mubr.msk.f32.mxu1 %vm1219_vm1, %v1220_v1  ;;  %v77_v4 = vld [vmem:[#allocation6 + $0x10] sm:$0xff]  ;;  %v1068_v5 = vpack.c.bf16 %v76_v3, %v75_v2  ;;  %v78_v6 = vld [vmem:[#allocation6 + $0x18] sm:$0xff]  ;;  %vm635_vm4 = vcmask 1045504   ;;  %vm538_vm5 = vcmask 64512  }
  0x39   :  { %60 = vst.msk [vmem:[#allocation2 + $0x20] sm:$0xf] %vm59_vm2, %v1220_v1  ;;  %v61_v7 = vld [vmem:[#allocation3] sm:$0xff]  ;;  %v1071_v8 = vpack.c.bf16 %v78_v6, %v77_v4  ;;  %v62_v10 = vld [vmem:[#allocation3 + $0x8] sm:$0xff]  ;;  %v66_v15 = vld [vmem:[#allocation3 + $0x10] sm:$0xff]  ;;  %s1221_s2 = smov [#allocation9]  }
  0x3a   :  { %1069 = vmatpush3.bf16.msra.mxu0 %v1068_v5  ;;  %v79_v9 = vld [vmem:[#allocation6 + $0x20] sm:$0xff]  ;;  %63 = vst.msk [vmem:[#allocation2 + $0x1] sm:$0xff] %vm54_vm0, %v61_v7  ;;  %v80_v11 = vld [vmem:[#allocation6 + $0x28] sm:$0xff]  ;;  %64 = vst.msk [vmem:[#allocation2 + $0x9] sm:$0xff] %vm54_vm0, %v62_v10  ;;  %s865_s21 = sshll.u32 %s1221_s2, 4  ;;  %s866_s21 = int_to_ptr.vmem [resolvable:$true] %s865_s21 }
  0x3b   :  { %1070 = vmatprep.subr.bf16.mxu0 %v1218_v0  ;;  %v89_v12 = vld [vmem:[#allocation6 + $0x40] sm:$0xff]  ;;  %v90_v13 = vld [vmem:[#allocation6 + $0x48] sm:$0xff]  ;;  %v91_v16 = vld [vmem:[#allocation6 + $0x50] sm:$0xff]  ;;  %68 = vst.msk [vmem:[#allocation2 + $0x13] sm:$0xff] %vm54_vm0, %v66_v15  ;;  %v1074_v18 = vpack.c.bf16 %v80_v11, %v79_v9  ;;  %s1185_s22 = scalar_lea.vmem %s866_s21, 512  ;;  %p1190_p11 = scmp.lt.s32.totalorder %s866_s21, %s866_s21 }
  0x3c   :  { %v1056_v14 = vpack.c.bf16 %v90_v13, %v89_v12  ;;  %v92_v17 = vld [vmem:[#allocation6 + $0x58] sm:$0xff]  ;;  %v81_v19 = vld [vmem:[#allocation6 + $0x30] sm:$0xff]  ;;  %v93_v23 = vld [vmem:[#allocation6 + $0x60] sm:$0xff]  ;;  %p1186_p10 = scmp.ne.s32.totalorder %s866_s21, %s1185_s22  ;;  %p1191_p12 = scmp.lt.s32.totalorder %s1185_s22, %s1185_s22 }
  0x3d   :  { %v1059_v20 = vpack.c.bf16 %v92_v17, %v91_v16  ;;  %v67_v21 = vld [vmem:[#allocation3 + $0x18] sm:$0xff]  ;;  %v94_v24 = vld [vmem:[#allocation6 + $0x68] sm:$0xff]  ;;  %v313_v27 = vld [vmem:[#allocation6 + $0x80] sm:$0xff] }
  0x3e   :  { %1072 = vmatpush3.bf16.msra.mxu0 %v1071_v8  ;;  %1057 = vmatpush3.bf16.msra.mxu1 %v1056_v14  ;;  %v82_v22 = vld [vmem:[#allocation6 + $0x38] sm:$0xff]  ;;  %69 = vst.msk [vmem:[#allocation2 + $0x1b] sm:$0xff] %vm54_vm0, %v67_v21  ;;  %v1062_v26 = vpack.c.bf16 %v94_v24, %v93_v23  ;;  %v314_v28 = vld [vmem:[#allocation6 + $0x88] sm:$0xff]  ;;  %v95_v29 = vld [vmem:[#allocation6 + $0x70] sm:$0xff]  ;;  %p1192_p13 = por %p1191_p12, %p1190_p11 }
  0x3f   :  { %1073 = vmatprep.subr.bf16.mxu0 %v1218_v0  ;;  %1058 = vmatprep.subr.bf16.mxu1 %v1218_v0  ;;  %v1077_v25 = vpack.c.bf16 %v82_v22, %v81_v19  ;;  %v96_v30 = vld [vmem:[#allocation6 + $0x78] sm:$0xff]  ;;  %v1080_v32 = vpack.c.bf16 %v314_v28, %v313_v27  ;;  %v315_v33 = vld [vmem:[#allocation6 + $0x90] sm:$0xff]  ;;  %v317_v38 = vld [vmem:[#allocation6 + $0xa0] sm:$0xff] }
  0x40   :  { %v316_v34 = vld [vmem:[#allocation6 + $0x98] sm:$0xff]  ;;  %v1065_v35 = vpack.c.bf16 %v96_v30, %v95_v29  ;;  %v318_v39 = vld [vmem:[#allocation6 + $0xa8] sm:$0xff]  ;;  %v319_v43 = vld [vmem:[#allocation6 + $0xb0] sm:$0xff]  ;;  %p1193_p0 = pnand %p1192_p13, %p1186_p10 }
  0x41   :  { %v70_v31 = vld [vmem:[#allocation2] sm:$0xff]  ;;  %v71_v36 = vld [vmem:[#allocation2 + $0x8] sm:$0xff]  ;;  %v1083_v37 = vpack.c.bf16 %v316_v34, %v315_v33  ;;  %v1086_v42 = vpack.c.bf16 %v318_v39, %v317_v38 }
  0x42   :  { %1075 = vmatpush3.bf16.msra.mxu0 %v1074_v18  ;;  %1060 = vmatpush3.bf16.msra.mxu1 %v1059_v20  ;;  %v83_v40 = vld [vmem:[#allocation2 + $0x1] sm:$0xff]  ;;  %v72_v41 = vld [vmem:[#allocation2 + $0x10] sm:$0xff] }
  0x43   :  { %1076 = vmatprep.subr.bf16.mxu0 %v1218_v0  ;;  %1061 = vmatprep.subr.bf16.mxu1 %v1218_v0  ;;  %v320_v44 = vld [vmem:[#allocation6 + $0xb8] sm:$0xff]  ;;  %v84_v45 = vld [vmem:[#allocation2 + $0x9] sm:$0xff]  ;;  %v85_v48 = vld [vmem:[#allocation2 + $0x11] sm:$0xff] }
  0x44   :  { %v1089_v47 = vpack.c.bf16 %v320_v44, %v319_v43  ;;  %v307_v51 = vld [vmem:[#allocation2 + $0x2] sm:$0xff]  ;;  %v308_v53 = vld [vmem:[#allocation2 + $0xa] sm:$0xff]  ;;  %v309_v54 = vld [vmem:[#allocation2 + $0x12] sm:$0xff] }
  0x45   :  { %v73_v46 = vld [vmem:[#allocation2 + $0x18] sm:$0xff]  ;;  %v74_v49 = vld [vmem:[#allocation2 + $0x20] sm:$0x3]  ;;  %v311_v56 = vld [vmem:[#allocation2 + $0x22] sm:$0x3] }
  0x46   :  { %1078 = vmatpush3.bf16.msra.mxu0 %v1077_v25  ;;  %1063 = vmatpush3.bf16.msra.mxu1 %v1062_v26  ;;  %v86_v50 = vld [vmem:[#allocation2 + $0x19] sm:$0xff]  ;;  %v87_v52 = vld [vmem:[#allocation2 + $0x21] sm:$0x3]  ;;  %v1364_v57 = vld [vmem:[#allocation8] sm:$0xff] }
  0x47   :  { %1079 = vmatprep.subr.bf16.mxu0 %v1218_v0  ;;  %1064 = vmatprep.subr.bf16.mxu1 %v1218_v0  ;;  %v310_v55 = vld [vmem:[#allocation2 + $0x1a] sm:$0xff] }
  0x49   :  { %990 = vmatmul.mubr.msk.f32.vlgmr.msra.gmra.mrb[0].mxu0 %vm54_vm0, %v70_v31 }
  0x4a   :  { %1081 = vmatpush3.bf16.msra.mxu0 %v1080_v32  ;;  %992 = vmatprep.mubr.msk.f32.mxu0 %vm1219_vm1, %v1220_v1 }
  0x4b   :  { %1082 = vmatprep.subr.bf16.mxu0 %v1218_v0  ;;  %1066 = vmatpush3.bf16.msra.mxu1 %v1065_v35 }
  0x4c   :  { %1035 = vmatprep.subr.mxu1 %v1220_v1 }
  0x4d   :  { %993 = vmatmul.mubr.msk.f32.gmra.mrb[2].mxu0 %vm54_vm0, %v71_v36 }
  0x4e   :  { %1084 = vmatpush3.bf16.msra.mxu0 %v1083_v37  ;;  %995 = vmatprep.mubr.msk.f32.mxu0 %vm1219_vm1, %v1220_v1 }
  0x4f   :  { %1085 = vmatprep.subr.bf16.mxu0 %v1218_v0  ;;  %959 = vmatmul.mubr.msk.f32.vlgmr.msra.gmra.mrb[0].mxu1 %vm54_vm0, %v83_v40 }
  0x50   :  { %961 = vmatprep.mubr.msk.f32.mxu1 %vm1219_vm1, %v1220_v1 }
  0x51   :  { %996 = vmatmul.mubr.msk.f32.gmra.mrb[4].mxu0 %vm54_vm0, %v72_v41 }
  0x52   :  { %998 = vmatprep.mubr.msk.f32.mxu0 %vm1219_vm1, %v1220_v1  ;;  %1087 = vmatpush3.bf16.msra.mxu0 %v1086_v42 }
  0x53   :  { %1088 = vmatprep.subr.bf16.mxu0 %v1218_v0  ;;  %962 = vmatmul.mubr.msk.f32.gmra.mrb[2].mxu1 %vm54_vm0, %v84_v45 }
  0x54   :  { %964 = vmatprep.mubr.msk.f32.mxu1 %vm1219_vm1, %v1220_v1  ;;  %1036 = vmatpush3.xpose.msra.mxu1 %v1364_v57 }
  0x55   :  { %999 = vmatmul.mubr.msk.f32.gmra.mrb[6].mxu0 %vm54_vm0, %v73_v46  ;;  %1040 = vmatprep.subr.mxu1 %v1220_v1 }
  0x56   :  { %1001 = vmatprep.mubr.msk.f32.mxu0 %vm1219_vm1, %v1220_v1  ;;  %1090 = vmatpush3.bf16.msra.mxu0 %v1089_v47 }
  0x57   :  { %965 = vmatmul.mubr.msk.f32.gmra.mrb[4].mxu1 %vm54_vm0, %v85_v48 }
  0x58   :  { %967 = vmatprep.mubr.msk.f32.mxu1 %vm1219_vm1, %v1220_v1 }
  0x59   :  { %1002 = vmatmul.mubr.msk.f32.gmra.mrb[8].mxu0 %vm54_vm0, %v74_v49 }
  0x5a   :  { %1020 = vmatprep.mubr.msk.f32.mxu0 %vm1219_vm1, %v1220_v1 }
  0x5b   :  { %968 = vmatmul.mubr.msk.f32.gmra.mrb[6].mxu1 %vm54_vm0, %v86_v50 }
  0x5c   :  { %970 = vmatprep.mubr.msk.f32.mxu1 %vm1219_vm1, %v1220_v1 }
  0x5d   :  { %1021 = vmatmul.mubr.msk.f32.vlgmr.msra.gmra.mrb[0].mxu0 %vm54_vm0, %v307_v51 }
  0x5e   :  { %1023 = vmatprep.mubr.msk.f32.mxu0 %vm1219_vm1, %v1220_v1 }
  0x5f   :  { %971 = vmatmul.mubr.msk.f32.gmra.mrb[8].mxu1 %vm54_vm0, %v87_v52 }
  0x60   :  { %1037 = vmatprep.mubr.msk.f32.mxu1 %vm1219_vm1, %v1220_v1 }
  0x61   :  { %1024 = vmatmul.mubr.msk.f32.gmra.mrb[2].mxu0 %vm54_vm0, %v308_v53 }
  0x62   :  { %1026 = vmatprep.mubr.msk.f32.mxu0 %vm1219_vm1, %v1220_v1 }
  0x65   :  { %1027 = vmatmul.mubr.msk.f32.gmra.mrb[4].mxu0 %vm54_vm0, %v309_v54 }
  0x66   :  { %1029 = vmatprep.mubr.msk.f32.mxu0 %vm1219_vm1, %v1220_v1 }
  0x69   :  { %1030 = vmatmul.mubr.msk.f32.gmra.mrb[6].mxu0 %vm54_vm0, %v310_v55 }
  0x6a   :  { %1032 = vmatprep.mubr.msk.f32.mxu0 %vm1219_vm1, %v1220_v1 }
  0x6d   :  { %1033 = vmatmul.mubr.msk.f32.gmra.mrb[8].mxu0 %vm54_vm0, %v311_v56 }
 0x122   :  { %v178_v58 = vpop.f32.mrb[0].mxu1 }
 0x123   :  { %v960_v59 = vpop.f32.mrb[1].mxu1 }
 0x126   :  { %v183_v60 = vpop.f32.mrb[2].mxu1 }
 0x127   :  { %v963_v61 = vpop.f32.mrb[3].mxu1 }
 0x12a   :  { %v188_v62 = vpop.f32.mrb[4].mxu1 }
 0x12b   :  { %v966_v63 = vpop.f32.mrb[5].mxu1 }
 0x12e   :  { %v193_v0 = vpop.f32.mrb[6].mxu1 }
 0x12f   :  { %v969_v2 = vpop.f32.mrb[7].mxu1 }
 0x130   :  { %v402_v3 = vpop.f32.mrb[0].mxu0 }
 0x131   :  { %v1368_v4 = vadd.f32 %v402_v3, %v178_v58  ;;  %v1022_v5 = vpop.f32.mrb[1].mxu0 }
 0x132   :  { %v198_v6 = vpop.f32.mrb[8].mxu1 }
 0x133   :  { %v972_v7 = vpop.f32.mrb[9].mxu1  ;;  %v438_v11 = vmul.f32 %v1368_v4, %v1368_v4 }
 0x134   :  { %v407_v8 = vpop.f32.mrb[2].mxu0 }
 0x135   :  { %v1370_v9 = vadd.f32 %v407_v8, %v183_v60  ;;  %v1025_v10 = vpop.f32.mrb[3].mxu0 }
 0x137   :  { %v431_v12 = vadd.f32 %v1370_v9, %v1368_v4  ;;  %v439_v13 = vmul.f32 %v1370_v9, %v1370_v9 }
 0x138   :  { %v412_v14 = vpop.f32.mrb[4].mxu0 }
 0x139   :  { %v432_v15 = vrot.slane %v431_v12, 4  ;;  %v440_v16 = vadd.f32 %v439_v13, %v438_v11  ;;  %v1378_v17 = vadd.f32 %v412_v14, %v188_v62  ;;  %v1028_v18 = vpop.f32.mrb[5].mxu0 }
 0x13b   :  { %v433_v19 = vadd.f32 %v432_v15, %v431_v12  ;;  %v441_v20 = vrot.slane %v440_v16, 4  ;;  %v650_v39 = vmul.f32 %v1378_v17, %v1378_v17  ;;  %v636_v50 = vrot.slane %v1378_v17, 2 }
 0x13c   :  { %v417_v21 = vpop.f32.mrb[6].mxu0 }
 0x13d   :  { %v434_v22 = vrot.slane %v433_v19, 2  ;;  %v442_v23 = vadd.f32 %v441_v20, %v440_v16  ;;  %v1380_v24 = vadd.f32 %v417_v21, %v193_v0  ;;  %v1031_v25 = vpop.f32.mrb[7].mxu0  ;;  %v656_v46 = vrot.slane %v650_v39, 2 }
 0x13e   :  { %v612_v20 = vlaneseq }
 0x13f   :  { %v435_v26 = vadd.f32 %v434_v22, %v433_v19  ;;  %v443_v27 = vrot.slane %v442_v23, 2  ;;  %v651_v38 = vmul.f32 %v1380_v24, %v1380_v24  ;;  %v637_v47 = vrot.slane %v1380_v24, 2 }
 0x140   :  { %v422_v28 = vpop.f32.mrb[8].mxu0  ;;  %v613_v21 = vshrl.u32 %v612_v20, 7 }
 0x141   :  { %v436_v29 = vrot.slane %v435_v26, 1  ;;  %v444_v30 = vadd.f32 %v443_v27, %v442_v23  ;;  %v1034_v31 = vpop.f32.mrb[9].mxu0  ;;  %v1382_v32 = vadd.f32 %v422_v28, %v198_v6  ;;  %v657_v42 = vrot.slane %v651_v38, 2 }
 0x142   :  { %v638_v55 = vsel %vm635_vm4, %v636_v50, %v637_v47  ;;  %v614_v22 = vsub.s32 0, %v613_v21  ;;  %v620_v23 = vsub.s32 1, %v613_v21 }
 0x143   :  { %v445_v33 = vrot.slane %v444_v30, 1  ;;  %v437_v34 = vadd.f32 %v436_v29, %v435_v26  ;;  %v652_v37 = vmul.f32 %v1382_v32, %v1382_v32  ;;  %v639_v43 = vrot.slane %v1382_v32, 2 }
 0x144   :  { %v658_v51 = vsel %vm635_vm4, %v656_v46, %v657_v42 }
 0x145   :  { %v446_v35 = vadd.f32 %v445_v33, %v444_v30  ;;  %v659_v40 = vrot.slane %v652_v37, 2  ;;  %v640_v52 = vsel %vm635_vm4, %v637_v47, %v639_v43 }
 0x146   :  { %v643_v58 = vadd.f32 %v640_v52, %v638_v55 }
 0x147   :  { %v448_v36 = vsel %vm447_vm3, %v437_v34, %v446_v35  ;;  %v660_v48 = vsel %vm635_vm4, %v657_v42, %v659_v40 }
 0x148   :  { %1038 = vmatmul.mubr.f32.vlgmr.msra.gmra.mrb[10].mxu1 %v448_v36  ;;  %v663_v54 = vadd.f32 %v660_v48, %v658_v51  ;;  %v644_v62 = vrot.slane %v643_v58, 4 }
 0x149   :  { %1041 = vmatpush3.msra.mxu1 %v1364_v57  ;;  %1042 = vmatprep.mubr.msk.f32.mxu1 %vm1219_vm1, %v1220_v1 }
 0x14a   :  { %1045 = vmatprep.subr.mxu1 %v1220_v1  ;;  %v664_v60 = vrot.slane %v663_v54, 4  ;;  %v645_v0 = vadd.f32 %v644_v62, %v643_v58 }
 0x14c   :  { %v665_v63 = vadd.f32 %v664_v60, %v663_v54  ;;  %v646_v3 = vrot.slane %v645_v0, 2 }
 0x14e   :  { %v666_v2 = vrot.slane %v665_v63, 2  ;;  %v647_v10 = vadd.f32 %v646_v3, %v645_v0 }
 0x150   :  { %v667_v5 = vadd.f32 %v666_v2, %v665_v63  ;;  %v648_v14 = vrot.slane %v647_v10, 1 }
 0x152   :  { %v668_v12 = vrot.slane %v667_v5, 1  ;;  %v649_v18 = vadd.f32 %v648_v14, %v647_v10 }
 0x154   :  { %v669_v16 = vadd.f32 %v668_v12, %v667_v5 }
 0x156   :  { %v670_v19 = vsel %vm447_vm3, %v649_v18, %v669_v16 }
 0x21b   :  { %v516_v41 = vpop.f32.mrb[10].mxu1 }
 0x21c   :  { %v520_v44 = vmul.f32 0.00390625, %v516_v41  ;;  %v1039_v45 = vpop.f32.mrb[11].mxu1 }
 0x21e   :  { %v521_v49 = vmul.f32 %v520_v44, %v520_v44  ;;  %v529_v7 = vsub.f32 0.0, %v520_v44 }
 0x220   :  { %v523_v53 = vrot.slane %v521_v49, 7 }
 0x222   :  { %v525_v56 = vsub.f32 %v520_v44, %v523_v53 }
 0x224   :  { %v526_v59 = vmax.f32 %v525_v56, 0.0 }
 0x226   :  { %v527_v61 = vadd.f32 1e-05, %v526_v59 }
 0x228   :  { %1115 = vrsqrt.f32 %v527_v61 }
 0x232   :  { %v1116_v6 = vpop.eup %1115 }
 0x233   :  { %v531_v8 = vrot.slane %v1116_v6, 1 }
 0x235   :  { %v533_v11 = vmul.f32 %v531_v8, %v529_v7 }
 0x237   :  { %v535_v13 = vrot.slane %v533_v11, 7 }
 0x239   :  { %v537_v15 = vsel %vm447_vm3, %v531_v8, %v535_v13 }
 0x23a   :  { %1043 = vmatmul.mubr.msk.f32.vlgmr.msra.gmra.mrb[12].mxu1 %vm538_vm5, %v537_v15 }
 0x23b   :  { %1046 = vmatpush3.xpose.msra.mxu1 %v1364_v57  ;;  %1047 = vmatprep.mubr.msk.f32.mxu1 %vm1219_vm1, %v1220_v1 }
 0x23c   :  { %1050 = vmatprep.subr.mxu1 %v1220_v1 }
 0x23e   :  { %1048 = vmatmul.mubr.f32.vlgmr.msra.gmra.mrb[14].mxu1 %v670_v19 }
 0x23f   :  { %1051 = vmatpush3.msra.mxu1 %v1364_v57  ;;  %1052 = vmatprep.mubr.msk.f32.mxu1 %vm1219_vm1, %v1220_v1 }
 0x30d   :  { %v608_v25 = vpop.f32.mrb[12].mxu1 }
 0x30e   :  { %v615_v26 = vrot.slane %v608_v25, %v614_v22  ;;  %v1044_v27 = vpop.f32.mrb[13].mxu1  ;;  %v621_v30 = vrot.slane %v608_v25, %v620_v23 }
 0x310   :  { %v616_v28 = vmul.f32 %v1368_v4, %v615_v26  ;;  %v617_v29 = vmul.f32 %v1370_v9, %v615_v26 }
 0x311   :  { %v738_v31 = vpop.f32.mrb[14].mxu1 }
 0x312   :  { %v622_v33 = vadd.f32 %v621_v30, %v616_v28  ;;  %v623_v34 = vadd.f32 %v621_v30, %v617_v29  ;;  %v742_v35 = vmul.f32 0.00390625, %v738_v31  ;;  %v1049_v57 = vpop.f32.mrb[15].mxu1 }
 0x314   :  { %vm624_vm6 = vcmp.gt.f32.partialorder %v622_v33, 0.0  ;;  %vm625_vm7 = vcmp.gt.f32.partialorder %v623_v34, 0.0  ;;  %v626_v1 = vmul.f32 0.01, %v622_v33  ;;  %v627_v36 = vmul.f32 0.01, %v623_v34 }
 0x315   :  { %v743_v37 = vmul.f32 %v742_v35, %v742_v35  ;;  %v751_v43 = vsub.f32 0.0, %v742_v35 }
 0x316   :  { %v628_v38 = vsel %vm624_vm6, %v622_v33, %v626_v1  ;;  %v629_v39 = vsel %vm625_vm7, %v623_v34, %v627_v36 }
 0x317   :  { %630 = vst [vmem:[#allocation9] sm:$0xff] %v628_v38  ;;  %631 = vst [vmem:[#allocation9 + $0x8] sm:$0xff] %v629_v39  ;;  %v745_v40 = vrot.slane %v743_v37, 7 }
 0x319   :  { %v747_v41 = vsub.f32 %v742_v35, %v745_v40 }
 0x31b   :  { %v748_v4 = vmax.f32 %v747_v41, 0.0 }
 0x31d   :  { %v749_v42 = vadd.f32 1e-05, %v748_v4 }
 0x31f   :  { %1117 = vrsqrt.f32 %v749_v42 }
 0x329   :  { %v1118_v9 = vpop.eup %1117 }
 0x32a   :  { %v753_v44 = vrot.slane %v1118_v9, 1 }
 0x32c   :  { %v755_v45 = vmul.f32 %v753_v44, %v751_v43 }
 0x32e   :  { %v757_v46 = vrot.slane %v755_v45, 7 }
 0x330   :  { %v759_v47 = vsel %vm447_vm3, %v753_v44, %v757_v46 }
 0x331   :  { %1053 = vmatmul.mubr.msk.f32.vlgmr.msra.gmra.mrb[16].mxu1 %vm538_vm5, %v759_v47 }
 0x404   :  { %v829_v48 = vpop.f32.mrb[16].mxu1 }
 0x405   :  { %v836_v49 = vrot.slane %v829_v48, %v614_v22  ;;  %v1054_v50 = vpop.f32.mrb[17].mxu1  ;;  %v843_v54 = vrot.slane %v829_v48, %v620_v23 }
 0x407   :  { %v837_v51 = vmul.f32 %v1378_v17, %v836_v49  ;;  %v838_v52 = vmul.f32 %v1380_v24, %v836_v49  ;;  %v839_v53 = vmul.f32 %v1382_v32, %v836_v49 }
 0x409   :  { %v844_v55 = vadd.f32 %v843_v54, %v837_v51  ;;  %v845_v56 = vadd.f32 %v843_v54, %v838_v52  ;;  %v846_v58 = vadd.f32 %v843_v54, %v839_v53 }
 0x40b   :  { %vm847_vm8 = vcmp.gt.f32.partialorder %v844_v55, 0.0  ;;  %vm848_vm9 = vcmp.gt.f32.partialorder %v845_v56, 0.0  ;;  %vm849_vm10 = vcmp.gt.f32.partialorder %v846_v58, 0.0  ;;  %v850_v59 = vmul.f32 0.01, %v844_v55 }
 0x40c   :  { %v851_v60 = vmul.f32 0.01, %v845_v56  ;;  %v852_v61 = vmul.f32 0.01, %v846_v58 }
 0x40d   :  { %v853_v62 = vsel %vm847_vm8, %v844_v55, %v850_v59 }
 0x40e   :  { %v854_v63 = vsel %vm848_vm9, %v845_v56, %v851_v60  ;;  %v855_v17 = vsel %vm849_vm10, %v846_v58, %v852_v61  ;;  %857 = vst [vmem:[#allocation9 + $0xe] sm:$0xfc] %v853_v62 }
 0x40f   :  { %858 = vst [vmem:[#allocation9 + $0x16] sm:$0xff] %v854_v63  ;;  %859 = vst [vmem:[#allocation9 + $0x1e] sm:$0x3] %v855_v17 }
 0x410   :  { %1196 = shalt.err (!%p1193_p0)
}
 0x411   :  { %s1197_s27 = scalar_lea.hbm %s1433_s3, 512 }
 0x412   :  { %p1198_p1 = scmp.ne.s32.totalorder %s1433_s3, %s1197_s27  ;;  %p1201_p2 = scmp.lt.u32.totalorder %s1197_s27, %s1433_s3 }
 0x414   :  { %p1203_p3 = pnand %p1201_p2, %p1198_p1 }
 0x416   :  { %1206 = shalt.err (!%p1203_p3)
}
 0x417   :  { %871 = dma.vmem_to_hbm [thread:$0]  %s866_s21, 512, %s1433_s3, [#allocation5], %s1215_s24, %s1215_s24, %s1216_s25  }
 0x418   :  { %1211 = dma.done.wait [#allocation5], 512  }
 0x419   :  { %1212 = vsyncadd [#allocation5], 4294966784 }
 0x41a   :  { %875 = vsyncpa [#allocation4], 1 }
 0x41b   :  { %876 = vsyncpa [#allocation7], 1 }
 0x41c   :  { %877 = vsyncpa [#allocation5], 1 }

</bundles_post_ra>
